<compile_context>
chip_gen: v7x
topology: tpu7x:2x2x1
jax: 0.10.0
libtpu: 0.0.40
codegen_flags: <defaults>
</compile_context>

<pallas_src>
import jax
import jax.numpy as jnp
from jax import lax
from jax.experimental import pallas as pl
from jax.experimental.pallas import tpu as pltpu


def _round_up(x, m):
    return ((x + m - 1) // m) * m


def _conv_bn_silu_kernel(p_ref, w_ref, bias_ref, o_ref):
    """One row-tile of the im2col matmul + folded BN bias + SiLU.

    p_ref:    (TM, K)      bf16 im2col patches (rows = N*H_out*W_out tile)
    w_ref:    (K, C_out)   bf16 conv weight with BN scale pre-folded (f32 fold)
    bias_ref: (1, C_out)   f32 folded BN bias
    o_ref:    (TM, C_out)  f32 output tile (un-padded channel dim)
    """
    # Single MXU matmul per tile, f32 accumulation.
    acc = jnp.dot(p_ref[...], w_ref[...], preferred_element_type=jnp.float32)
    y = acc + bias_ref[...]
    # SiLU: y * sigmoid(y), sigmoid via a single tanh (one EUP transcendental).
    o_ref[...] = (y * (0.5 * jnp.tanh(0.5 * y) + 0.5)).astype(o_ref.dtype)


def conv_block_forward(x_nchw, conv_w_oihw, bn_gamma, bn_beta,
                       bn_mean, bn_var, *, stride=1, padding=0, eps=1e-5,
                       compute_dtype=jnp.bfloat16):
    """ConvBlock forward: SiLU(BN(Conv2d(x))).  NCHW in, NCHW out."""
    n, c_in, h, w = x_nchw.shape
    c_out, c_in_w, kh, kw = conv_w_oihw.shape
    assert c_in == c_in_w

    h_out = (h + 2 * padding - kh) // stride + 1
    w_out = (w + 2 * padding - kw) // stride + 1
    assert h_out > 0 and w_out > 0

    # --- wrapper glue (plain JAX): im2col in bf16, BN folding ---------------
    x_nhwc = jnp.transpose(x_nchw, (0, 2, 3, 1)).astype(compute_dtype)
    x_pad = jnp.pad(
        x_nhwc, ((0, 0), (padding, padding), (padding, padding), (0, 0)))

    taps = []
    for i in range(kh):
        for j in range(kw):
            taps.append(lax.slice(
                x_pad,
                (0, i, j, 0),
                (n, i + stride * (h_out - 1) + 1,
                 j + stride * (w_out - 1) + 1, c_in),
                (1, stride, stride, 1)))          # (N, H_out, W_out, C_in)
    # (N, H_out, W_out, KH*KW, C_in) -> (rows, K), K ordered [kh, kw, c_in].
    k = kh * kw * c_in
    rows = n * h_out * w_out
    patches = jnp.stack(taps, axis=3).reshape(rows, k)   # bf16, un-padded K

    # Row tile: large enough to amortize ~0.35us/step and reach the DMA
    # roofline, capped so the grid has >= 2 steps (v7x: 2 TensorCores).
    if rows <= 256:
        tm = _round_up(rows, 128)
    else:
        tm = min(1024, _round_up((rows + 1) // 2, 128))
    rows_pad = _round_up(rows, tm)
    if rows_pad != rows:
        patches = jnp.pad(patches, ((0, rows_pad - rows), (0, 0)))

    # Fold BN scale into the weights in f32, then cast to bf16.
    scale = (bn_gamma / jnp.sqrt(bn_var + eps)).astype(jnp.float32)
    bias = (bn_beta - bn_mean * scale).astype(jnp.float32).reshape(1, c_out)
    # OIHW -> (KH, KW, C_in, C_out) -> (K, C_out), same [kh, kw, c_in] order.
    w2d = jnp.transpose(conv_w_oihw, (2, 3, 1, 0)).reshape(k, c_out)
    w2d = (w2d.astype(jnp.float32) * scale[None, :]).astype(compute_dtype)

    grid = (rows_pad // tm,)

    out = pl.pallas_call(
        _conv_bn_silu_kernel,
        out_shape=jax.ShapeDtypeStruct((rows_pad, c_out), jnp.float32),
        grid=grid,
        in_specs=[
            pl.BlockSpec((tm, k), lambda i: (i, 0)),        # last dim == full K
            pl.BlockSpec((k, c_out), lambda i: (0, 0)),     # whole weight, resident
            pl.BlockSpec((1, c_out), lambda i: (0, 0)),     # folded BN bias
        ],
        out_specs=pl.BlockSpec((tm, c_out), lambda i: (i, 0)),
        compiler_params=pltpu.CompilerParams(
            dimension_semantics=("parallel",)),   # row-tiles shard across TCs
    )(patches, w2d, bias)

    # Drop the padded rows, restore (N, C_out, H_out, W_out) to match PyTorch.
    out = out[:rows, :].reshape(n, h_out, w_out, c_out)
    return jnp.transpose(out, (0, 3, 1, 2))


def _reference(x_nchw, conv_w_oihw, bn_gamma, bn_beta, bn_mean, bn_var,
               *, stride=1, padding=0, eps=1e-5):
    """Pure-JAX reference mirroring the kernel's bf16 rounding of x and of the
    scale-folded weights, so the tolerance only covers accumulation order and
    the tanh-based sigmoid."""
    scale = bn_gamma / jnp.sqrt(bn_var + eps)
    bias = bn_beta - bn_mean * scale
    w_fold = (conv_w_oihw * scale[:, None, None, None]
              ).astype(jnp.bfloat16).astype(jnp.float32)
    x_bf = x_nchw.astype(jnp.bfloat16).astype(jnp.float32)
    y = lax.conv_general_dilated(
        x_bf, w_fold,
        window_strides=(stride, stride),
        padding=((padding, padding), (padding, padding)),
        dimension_numbers=("NCHW", "OIHW", "NCHW"))
    y = y + bias[None, :, None, None]
    return y * jax.nn.sigmoid(y)


if __name__ == "__main__":
    # Small shapes consistent with the module: in=4, out=8, k=3, stride=1, pad=1.
    N, C_IN, H, W = 2, 4, 16, 16
    C_OUT, K, STRIDE, PAD = 8, 3, 1, 1

    key = jax.random.PRNGKey(0)
    k_x, k_w, k_g, k_b, k_m, k_v = jax.random.split(key, 6)

    x = jax.random.normal(k_x, (N, C_IN, H, W), dtype=jnp.float32)
    conv_w = jax.random.normal(k_w, (C_OUT, C_IN, K, K), dtype=jnp.float32) * 0.1
    bn_gamma = 1.0 + 0.1 * jax.random.normal(k_g, (C_OUT,), dtype=jnp.float32)
    bn_beta = 0.1 * jax.random.normal(k_b, (C_OUT,), dtype=jnp.float32)
    bn_mean = 0.1 * jax.random.normal(k_m, (C_OUT,), dtype=jnp.float32)
    bn_var = jnp.abs(jax.random.normal(k_v, (C_OUT,), dtype=jnp.float32)) + 0.5

    out = conv_block_forward(x, conv_w, bn_gamma, bn_beta, bn_mean, bn_var,
                             stride=STRIDE, padding=PAD)
    out = jax.block_until_ready(out)
    assert out.shape == (N, C_OUT, H, W)

    ref = _reference(x, conv_w, bn_gamma, bn_beta, bn_mean, bn_var,
                     stride=STRIDE, padding=PAD)
    max_err = float(jnp.max(jnp.abs(out - ref)))
    assert jnp.allclose(out, ref, atol=5e-3, rtol=5e-3), (
        "mismatch vs reference: max abs err = %g" % max_err)

    print("KERNEL_OK")
</pallas_src>

<mosaic_0001>
module attributes {stable_mosaic.version = 11 : i64} {
  func.func @_conv_bn_silu_kernel(%arg0: i32, %arg1: memref<256x36xbf16, #tpu.memory_space<vmem>>, %arg2: memref<36x8xbf16, #tpu.memory_space<vmem>>, %arg3: memref<1x8xf32, #tpu.memory_space<vmem>>, %arg4: memref<256x8xf32, #tpu.memory_space<vmem>>) attributes {dimension_semantics = [#tpu.dimension_semantics<parallel>], iteration_bounds = array<i64: 2>, scalar_prefetch = 0 : i64, scratch_operands = 0 : i64, tpu.core_type = #tpu.core_type<tc>, window_params = [{transform_indices = @transform_0, window_bounds = array<i64: 256, 36>}, {pipeline_mode = #tpu.pipeline_mode<synchronous>, transform_indices = @transform_1, window_bounds = array<i64: 36, 8>}, {pipeline_mode = #tpu.pipeline_mode<synchronous>, transform_indices = @transform_2, window_bounds = array<i64: 1, 8>}, {transform_indices = @transform_3, window_bounds = array<i64: 256, 8>}]} {
    %c0 = arith.constant 0 : index
    %c0_0 = arith.constant 0 : index
    %0 = vector.load %arg1[%c0, %c0_0] : memref<256x36xbf16, #tpu.memory_space<vmem>>, vector<256x36xbf16>
    %c0_1 = arith.constant 0 : index
    %c0_2 = arith.constant 0 : index
    %1 = vector.load %arg2[%c0_1, %c0_2] : memref<36x8xbf16, #tpu.memory_space<vmem>>, vector<36x8xbf16>
    %cst = arith.constant dense<0.000000e+00> : vector<256x8xf32>
    %2 = tpu.matmul %0, %1, %cst {dimension_numbers = #tpu.dot_dimension_numbers<[1], [0], [0], [1], [0, 0, 1, 1], [], []>} : vector<256x36xbf16>, vector<36x8xbf16>, vector<256x8xf32> -> vector<256x8xf32>
    %c0_3 = arith.constant 0 : index
    %c0_4 = arith.constant 0 : index
    %3 = vector.load %arg3[%c0_3, %c0_4] : memref<1x8xf32, #tpu.memory_space<vmem>>, vector<1x8xf32>
    %4 = vector.broadcast %3 : vector<1x8xf32> to vector<256x8xf32>
    %5 = arith.addf %2, %4 : vector<256x8xf32>
    %cst_5 = arith.constant 5.000000e-01 : f32
    %6 = vector.broadcast %cst_5 : f32 to vector<256x8xf32>
    %7 = arith.mulf %6, %5 : vector<256x8xf32>
    %8 = math.tanh %7 : vector<256x8xf32>
    %cst_6 = arith.constant 5.000000e-01 : f32
    %9 = vector.broadcast %cst_6 : f32 to vector<256x8xf32>
    %10 = arith.mulf %9, %8 : vector<256x8xf32>
    %cst_7 = arith.constant 5.000000e-01 : f32
    %11 = vector.broadcast %cst_7 : f32 to vector<256x8xf32>
    %12 = arith.addf %10, %11 : vector<256x8xf32>
    %13 = arith.mulf %5, %12 : vector<256x8xf32>
    %c0_8 = arith.constant 0 : index
    %c0_9 = arith.constant 0 : index
    %14 = vector.load %arg4[%c0_8, %c0_9] : memref<256x8xf32, #tpu.memory_space<vmem>>, vector<256x8xf32>
    tpu.vector_store %arg4[%c0_8, %c0_9], %13 {strides = array<i32>} : memref<256x8xf32, #tpu.memory_space<vmem>>, vector<256x8xf32>,
    return
  }
  func.func @transform_0(%arg0: i32) -> (i32, i32) {
    %c0_i32 = arith.constant 0 : i32
    %c0_i32_0 = arith.constant 0 : i32
    return %arg0, %c0_i32 : i32, i32
  }
  func.func @transform_1(%arg0: i32) -> (i32, i32) {
    %c0_i32 = arith.constant 0 : i32
    %c0_i32_0 = arith.constant 0 : i32
    %c0_i32_1 = arith.constant 0 : i32
    return %c0_i32, %c0_i32_0 : i32, i32
  }
  func.func @transform_2(%arg0: i32) -> (i32, i32) {
    %c0_i32 = arith.constant 0 : i32
    %c0_i32_0 = arith.constant 0 : i32
    %c0_i32_1 = arith.constant 0 : i32
    return %c0_i32, %c0_i32_0 : i32, i32
  }
  func.func @transform_3(%arg0: i32) -> (i32, i32) {
    %c0_i32 = arith.constant 0 : i32
    %c0_i32_0 = arith.constant 0 : i32
    return %arg0, %c0_i32 : i32, i32
  }
}

</mosaic_0001>

<bundles_post_ra>
// kernel: tpu_custom_call.1
= control target key start
LH: loop header
LB: loop body
LE: loop exit
PB: predicated region body
PF: predicated region fallthrough
CT: control target
= control target key end

     0   :  { %s1008_s12 = smov 0   ;;  %s1336_s0 = inlined_call_operand.vmem [shape: bf16[512,36], index: 0, kind: input, shape index: {}]   ;;  %s1337_s1 = inlined_call_operand.vmem [shape: bf16[36,8], index: 1, kind: input, shape index: {}]   ;;  %s1338_s2 = inlined_call_operand.vmem [shape: f32[1,8], index: 2, kind: input, shape index: {}]   ;;  %s1339_s3 = inlined_call_operand.vmem [shape: f32[512,8], index: 3, kind: output, shape index: {}]  }
   0x1 LB: > { %s777_s13 = sadd.s32 4294967295, %s986_s12   ;;  %p781_p0 = scmp.ge.s32.totalorder %s986_s12, 1  ;;  %s986_s12 = sphi %s1008_s12, %s13_s12  }
   0x2   : > { %p138_p1 = scmp.lt.s32.totalorder %s986_s12, 3 }
   0x4   : > { %p139_p2 = pnand %p781_p0, %p138_p1 }
   0x5   : > { %v897_v0 = vld [vmem:[%s1337_s1] sm:$0xff] (!%p139_p2)   ;;  %v898_v1 = vld [vmem:[%s1337_s1 + $0x8] sm:$0xff] (!%p139_p2)   ;;  %s782_s18 = sshll.u32 (!%p139_p2), %s777_s13, 5  ;;  %v899_v2 = vld [vmem:[%s1337_s1 + $0x10] ss:$0 sps:$4 sm:$0x33] (!%p139_p2)  }
   0x6   : > { %142 = sbr.rel (%p139_p2) target bundleno = 296 (0x128), region = 32  ;;  %843 = vmatprep.subr.bf16.mxu0 (!%p139_p2), %v897_v0  ;;  %881 = vmatprep.subr.bf16.mxu1 (!%p139_p2), %v897_v0  ;;  %p163_p3 = scmp.lt.s32.totalorder (!%p139_p2), %s782_s18, 63  ;;  %vm363_vm0 = vcmask (!%p139_p2), 1041408   ;;  %vm314_vm1 = vcmask (!%p139_p2), 293888   ;;  %v1068_v20 = vld [vmem:[%s1338_s2] ss:$0 sm:$0xff] (!%p139_p2) }
   0x7   : > { %844 = vmatpush3.bf16.msra.mxu0 (!%p139_p2), %v897_v0  ;;  %884 = vmatpush3.bf16.msra.mxu1 (!%p139_p2), %v897_v0  ;;  %v365_v3 = vsel (!%p139_p2), %vm363_vm0, %v899_v2, 0  ;;  %vm688_vm2 = vcmask (!%p139_p2), 64512  }
   0x8   : > { %845 = vmatprep.subr.bf16.mxu0 (!%p139_p2), %v898_v1  ;;  %882 = vmatprep.subr.bf16.mxu1 (!%p139_p2), %v898_v1 }
   0xb   : > { %846 = vmatpush3.bf16.msra.mxu0 (!%p139_p2), %v898_v1  ;;  %885 = vmatpush3.bf16.msra.mxu1 (!%p139_p2), %v898_v1 }
   0xc   : > { %887 = vmatprep.subr.msk.bf16.mxu0 (!%p139_p2), %vm363_vm0, %v899_v2  ;;  %888 = vmatprep.subr.msk.bf16.mxu1 (!%p139_p2), %vm363_vm0, %v899_v2 }
   0xd   : > { %s1341_s18 = smov (!%p163_p3, %s782_s18), 63 }
   0xe   : > { %s783_s21 = sshll.u32 %s1341_s18, 2  ;;  %s785_s27 = sshll.u32 %s1341_s18, 3 }
   0xf   : > { %s1031_s24 = scalar_lea.vmem %s1336_s0, %s783_s21  ;;  %848 = vmatpush3.bf16.msra.mxu0 %v365_v3  ;;  %886 = vmatpush3.bf16.msra.mxu1 %v365_v3  ;;  %s1149_s30 = scalar_lea.vmem %s1339_s3, %s785_s27 }
  0x10   : > { %v900_v4 = vld [vmem:[%s1031_s24] sm:$0xff]   ;;  %v902_v6 = vld [vmem:[%s1031_s24 + $0x8] sm:$0xff]   ;;  %v904_v8 = vld [vmem:[%s1031_s24 + $0x10] sm:$0xff]  }
  0x11   : > { %v901_v5 = vld [vmem:[%s1031_s24 + $0x40] sm:$0xff]   ;;  %849 = vmatprep.mubr.msk.bf16.mxu0 %vm314_vm1, %v900_v4  ;;  %v903_v7 = vld [vmem:[%s1031_s24 + $0x48] sm:$0xff]   ;;  %v905_v9 = vld [vmem:[%s1031_s24 + $0x50] sm:$0xff]  }
  0x12   : > { %865 = vmatprep.mubr.msk.bf16.mxu1 %vm314_vm1, %v901_v5  ;;  %850 = vmatmul.mubr.msk.bf16.vlgmr.msra.gmra.mrb[0].mxu0 %vm314_vm1, %v902_v6  ;;  %v906_v10 = vld [vmem:[%s1031_s24 + $0x18] sm:$0xff]   ;;  %v908_v12 = vld [vmem:[%s1031_s24 + $0x20] sm:$0xff]   ;;  %v910_v14 = vld [vmem:[%s1031_s24 + $0x28] sm:$0xff]  }
  0x13   : > { %866 = vmatmul.mubr.msk.bf16.vlgmr.msra.gmra.mrb[0].mxu1 %vm314_vm1, %v903_v7  ;;  %853 = vmatprep.mubr.msk.bf16.mxu0 %vm314_vm1, %v904_v8  ;;  %v907_v11 = vld [vmem:[%s1031_s24 + $0x58] sm:$0xff]   ;;  %v909_v13 = vld [vmem:[%s1031_s24 + $0x60] sm:$0xff]   ;;  %v911_v15 = vld [vmem:[%s1031_s24 + $0x68] sm:$0xff]  }
  0x14   : > { %869 = vmatprep.mubr.msk.bf16.mxu1 %vm314_vm1, %v905_v9  ;;  %v912_v16 = vld [vmem:[%s1031_s24 + $0x30] sm:$0xff]   ;;  %v914_v18 = vld [vmem:[%s1031_s24 + $0x38] sm:$0xff]  }
  0x15   : > { %v913_v17 = vld [vmem:[%s1031_s24 + $0x70] sm:$0xff]   ;;  %v915_v19 = vld [vmem:[%s1031_s24 + $0x78] sm:$0xff]  }
  0x1a   : > { %854 = vmatmul.mubr.msk.bf16.gmra.mrb[4].mxu0 %vm314_vm1, %v906_v10 }
  0x1b   : > { %870 = vmatmul.mubr.msk.bf16.gmra.mrb[4].mxu1 %vm314_vm1, %v907_v11  ;;  %857 = vmatprep.mubr.msk.bf16.mxu0 %vm314_vm1, %v908_v12 }
  0x1c   : > { %873 = vmatprep.mubr.msk.bf16.mxu1 %vm314_vm1, %v909_v13 }
  0x22   : > { %858 = vmatmul.mubr.msk.bf16.gmra.mrb[8].mxu0 %vm314_vm1, %v910_v14 }
  0x23   : > { %874 = vmatmul.mubr.msk.bf16.gmra.mrb[8].mxu1 %vm314_vm1, %v911_v15  ;;  %861 = vmatprep.mubr.msk.bf16.mxu0 %vm314_vm1, %v912_v16 }
  0x24   : > { %877 = vmatprep.mubr.msk.bf16.mxu1 %vm314_vm1, %v913_v17 }
  0x2a   : > { %862 = vmatmul.mubr.msk.bf16.gmra.mrb[12].mxu0 %vm314_vm1, %v914_v18 }
  0x2b   : > { %878 = vmatmul.mubr.msk.bf16.gmra.mrb[12].mxu1 %vm314_vm1, %v915_v19 }
  0xe5   : > { %v851_v21 = vpop.f32.mrb[0].mxu0 }
  0xe6   : > { %v867_v22 = vpop.f32.mrb[0].mxu1  ;;  %v1071_v23 = vadd.f32 %v851_v21, %v1068_v20  ;;  %v401_v25 = vpop.f32.mrb[1].mxu0 }
  0xe7   : > { %v1074_v24 = vadd.f32 %v867_v22, %v1068_v20  ;;  %v465_v26 = vpop.f32.mrb[1].mxu1  ;;  %v1077_v27 = vadd.f32 %v1068_v20, %v401_v25  ;;  %v852_v29 = vpop.f32.mrb[2].mxu0 }
  0xe8   : > { %v1080_v28 = vadd.f32 %v1068_v20, %v465_v26  ;;  %v868_v30 = vpop.f32.mrb[2].mxu1  ;;  %v530_v31 = vmul.f32 0.5, %v1071_v23  ;;  %v1085_v33 = vadd.f32 %v852_v29, %v1068_v20  ;;  %v404_v35 = vpop.f32.mrb[3].mxu0 }
  0xe9   : > { %v546_v32 = vmul.f32 0.5, %v1074_v24  ;;  %v1088_v34 = vadd.f32 %v868_v30, %v1068_v20  ;;  %v468_v36 = vpop.f32.mrb[3].mxu1  ;;  %v528_v37 = vmul.f32 0.5, %v1077_v27  ;;  %v1093_v39 = vadd.f32 %v1068_v20, %v404_v35 }
  0xea   : > { %v544_v38 = vmul.f32 0.5, %v1080_v28  ;;  %v1096_v40 = vadd.f32 %v1068_v20, %v468_v36  ;;  %916 = vtanh.f32 %v530_v31  ;;  %v531_v41 = vmul.f32 0.5, %v1085_v33 }
  0xeb   : > { %918 = vtanh.f32 %v546_v32  ;;  %v547_v42 = vmul.f32 0.5, %v1088_v34  ;;  %v529_v43 = vmul.f32 0.5, %v1093_v39 }
  0xec   : > { %920 = vtanh.f32 %v528_v37  ;;  %v545_v44 = vmul.f32 0.5, %v1096_v40 }
  0xed   : > { %922 = vtanh.f32 %v544_v38  ;;  %v855_v45 = vpop.f32.mrb[4].mxu0 }
  0xee   : > { %v871_v46 = vpop.f32.mrb[4].mxu1  ;;  %924 = vtanh.f32 %v531_v41  ;;  %v1103_v47 = vadd.f32 %v855_v45, %v1068_v20  ;;  %v417_v49 = vpop.f32.mrb[5].mxu0 }
  0xef   : > { %v1106_v48 = vadd.f32 %v871_v46, %v1068_v20  ;;  %v481_v50 = vpop.f32.mrb[5].mxu1  ;;  %926 = vtanh.f32 %v547_v42  ;;  %v1109_v51 = vadd.f32 %v1068_v20, %v417_v49  ;;  %v856_v53 = vpop.f32.mrb[6].mxu0 }
  0xf0   : > { %v1112_v52 = vadd.f32 %v1068_v20, %v481_v50  ;;  %v872_v54 = vpop.f32.mrb[6].mxu1  ;;  %928 = vtanh.f32 %v529_v43  ;;  %v534_v55 = vmul.f32 0.5, %v1103_v47  ;;  %v1117_v57 = vadd.f32 %v856_v53, %v1068_v20  ;;  %v420_v58 = vpop.f32.mrb[7].mxu0 }
  0xf1   : > { %v550_v56 = vmul.f32 0.5, %v1106_v48  ;;  %v484_v59 = vpop.f32.mrb[7].mxu1  ;;  %930 = vtanh.f32 %v545_v44  ;;  %v532_v60 = vmul.f32 0.5, %v1109_v51  ;;  %v1122_v62 = vadd.f32 %v872_v54, %v1068_v20 }
  0xf2   : > { %v548_v61 = vmul.f32 0.5, %v1112_v52  ;;  %932 = vtanh.f32 %v534_v55  ;;  %v535_v63 = vmul.f32 0.5, %v1117_v57  ;;  %v1126_v0 = vadd.f32 %v1068_v20, %v420_v58 }
  0xf3   : > { %v1129_v1 = vadd.f32 %v1068_v20, %v484_v59  ;;  %934 = vtanh.f32 %v550_v56  ;;  %v551_v2 = vmul.f32 0.5, %v1122_v62 }
  0xf4   : > { %v917_v3 = vpop.eup %916  ;;  %936 = vtanh.f32 %v532_v60  ;;  %v533_v4 = vmul.f32 0.5, %v1126_v0 }
  0xf5   : > { %v919_v5 = vpop.eup %918  ;;  %v594_v6 = vmul.f32 0.5, %v917_v3  ;;  %938 = vtanh.f32 %v548_v61  ;;  %v549_v7 = vmul.f32 0.5, %v1129_v1  ;;  %v859_v8 = vpop.f32.mrb[8].mxu0 }
  0xf6   : > { %v875_v9 = vpop.f32.mrb[8].mxu1  ;;  %v921_v10 = vpop.eup %920  ;;  %v610_v11 = vmul.f32 0.5, %v919_v5  ;;  %940 = vtanh.f32 %v535_v63  ;;  %v1136_v12 = vadd.f32 %v859_v8, %v1068_v20 }
  0xf7   : > { %v1139_v13 = vadd.f32 %v875_v9, %v1068_v20  ;;  %v433_v14 = vpop.f32.mrb[9].mxu0  ;;  %v497_v15 = vpop.f32.mrb[9].mxu1  ;;  %v626_v17 = vadd.f32 0.5, %v594_v6  ;;  %v592_v18 = vmul.f32 0.5, %v921_v10  ;;  %942 = vtanh.f32 %v551_v2 }
  0xf8   : > { %v923_v16 = vpop.eup %922  ;;  %v1142_v19 = vadd.f32 %v1068_v20, %v433_v14  ;;  %v860_v21 = vpop.f32.mrb[10].mxu0  ;;  %v642_v26 = vadd.f32 0.5, %v610_v11  ;;  %944 = vtanh.f32 %v533_v4  ;;  %v538_v30 = vmul.f32 0.5, %v1136_v12 }
  0xf9   : > { %v1144_v22 = vpop.f32.mrb[10].mxu1  ;;  %v925_v25 = vpop.eup %924  ;;  %v608_v29 = vmul.f32 0.5, %v923_v16  ;;  %v658_v36 = vmul.f32 %v626_v17, %v1071_v23  ;;  %v624_v37 = vadd.f32 0.5, %v592_v18  ;;  %946 = vtanh.f32 %v549_v7 }
  0xfa   : > { %v1152_v31 = vpop.f32.mrb[11].mxu0  ;;  %v1154_v32 = vpop.f32.mrb[11].mxu1  ;;  %v595_v38 = vmul.f32 0.5, %v925_v25  ;;  %v674_v42 = vmul.f32 %v642_v26, %v1074_v24  ;;  %948 = vtanh.f32 %v538_v30  ;;  %v554_v23 = vmul.f32 0.5, %v1139_v13 }
  0xfb   : > { %v927_v35 = vpop.eup %926  ;;  %v640_v43 = vadd.f32 0.5, %v608_v29  ;;  %691 = vst.msk [vmem:[%s1149_s30 + $0x10] sm:$0xff] %vm688_vm2, %v658_v36  ;;  %v656_v46 = vmul.f32 %v624_v37, %v1077_v27  ;;  %v536_v56 = vmul.f32 0.5, %v1142_v19  ;;  %v1184_v10 = vadd.f32 %v1068_v20, %v497_v15 }
  0xfc   : > { %v929_v41 = vpop.eup %928  ;;  %v611_v44 = vmul.f32 0.5, %v927_v35  ;;  %v627_v49 = vadd.f32 0.5, %v595_v38  ;;  %707 = vst.msk [vmem:[%s1149_s30 + $0x90] sm:$0xff] %vm688_vm2, %v674_v42  ;;  %950 = vtanh.f32 %v554_v23  ;;  %v1194_v25 = vadd.f32 %v860_v21, %v1068_v20 }
  0xfd   : > { %v931_v45 = vpop.eup %930  ;;  %v593_v50 = vmul.f32 0.5, %v929_v41  ;;  %v672_v54 = vmul.f32 %v640_v43, %v1080_v28  ;;  %689 = vst.msk [vmem:[%s1149_s30] sm:$0xff] %vm688_vm2, %v656_v46  ;;  %v1169_v61 = vpop.f32.mrb[12].mxu0  ;;  %952 = vtanh.f32 %v536_v56 }
  0xfe   : > { %v933_v53 = vpop.eup %932  ;;  %v643_v24 = vadd.f32 0.5, %v611_v44  ;;  %v609_v55 = vmul.f32 0.5, %v931_v45  ;;  %v659_v27 = vmul.f32 %v627_v49, %v1085_v33  ;;  %v1171_v63 = vpop.f32.mrb[12].mxu1  ;;  %v539_v41 = vmul.f32 0.5, %v1194_v25 }
  0xff   : > { %v935_v58 = vpop.eup %934  ;;  %v625_v59 = vadd.f32 0.5, %v593_v50  ;;  %v598_v60 = vmul.f32 0.5, %v933_v53  ;;  %705 = vst.msk [vmem:[%s1149_s30 + $0x80] sm:$0xff] %vm688_vm2, %v672_v54  ;;  %v1176_v5 = vpop.f32.mrb[13].mxu0 }
 0x100   : > { %v937_v2 = vpop.eup %936  ;;  %v675_v28 = vmul.f32 %v643_v24, %v1088_v34  ;;  %v641_v3 = vadd.f32 0.5, %v609_v55  ;;  %v614_v4 = vmul.f32 0.5, %v935_v58  ;;  %v1178_v6 = vpop.f32.mrb[13].mxu1  ;;  %692 = vst.msk [vmem:[%s1149_s30 + $0x18] sm:$0xff] %vm688_vm2, %v659_v27  ;;  %v1226_v24 = vadd.f32 %v1068_v20, %v1152_v31 }
 0x101   : > { %v939_v33 = vpop.eup %938  ;;  %v657_v7 = vmul.f32 %v625_v59, %v1093_v39  ;;  %v630_v8 = vadd.f32 0.5, %v598_v60  ;;  %v596_v9 = vmul.f32 0.5, %v937_v2  ;;  %v1186_v11 = vpop.f32.mrb[14].mxu0 }
 0x102   : > { %v1188_v34 = vpop.f32.mrb[14].mxu1  ;;  %v941_v14 = vpop.eup %940  ;;  %708 = vst.msk [vmem:[%s1149_s30 + $0x98] sm:$0xff] %vm688_vm2, %v675_v28  ;;  %v673_v16 = vmul.f32 %v641_v3, %v1096_v40  ;;  %v646_v17 = vadd.f32 0.5, %v614_v4  ;;  %v612_v18 = vmul.f32 0.5, %v939_v33  ;;  %v552_v40 = vmul.f32 0.5, %v1184_v10 }
 0x103   : > { %v1196_v39 = vpop.f32.mrb[15].mxu0  ;;  %v1198_v15 = vpop.f32.mrb[15].mxu1  ;;  %690 = vst.msk [vmem:[%s1149_s30 + $0x8] sm:$0xff] %vm688_vm2, %v657_v7  ;;  %v662_v29 = vmul.f32 %v630_v8, %v1103_v47  ;;  %v628_v30 = vadd.f32 0.5, %v596_v9  ;;  %v599_v35 = vmul.f32 0.5, %v941_v14  ;;  %v537_v59 = vmul.f32 0.5, %v1226_v24 }
 0x104   : > { %v943_v26 = vpop.eup %942  ;;  %706 = vst.msk [vmem:[%s1149_s30 + $0x88] sm:$0xff] %vm688_vm2, %v673_v16  ;;  %v678_v21 = vmul.f32 %v646_v17, %v1106_v48  ;;  %v644_v37 = vadd.f32 0.5, %v612_v18  ;;  %954 = vtanh.f32 %v552_v40  ;;  %v1257_v3 = vadd.f32 %v1068_v20, %v1176_v5 }
 0x105   : > { %v945_v36 = vpop.eup %944  ;;  %v615_v38 = vmul.f32 0.5, %v943_v26  ;;  %695 = vst.msk [vmem:[%s1149_s30 + $0x30] sm:$0xff] %vm688_vm2, %v662_v29  ;;  %v660_v47 = vmul.f32 %v628_v30, %v1109_v51  ;;  %v631_v43 = vadd.f32 0.5, %v599_v35  ;;  %956 = vtanh.f32 %v539_v41 }
 0x106   : > { %v947_v42 = vpop.eup %946  ;;  %v597_v44 = vmul.f32 0.5, %v945_v36  ;;  %711 = vst.msk [vmem:[%s1149_s30 + $0xb0] sm:$0xff] %vm688_vm2, %v678_v21  ;;  %v676_v48 = vmul.f32 %v644_v37, %v1112_v52  ;;  %v1219_v51 = vadd.f32 %v1144_v22, %v1068_v20  ;;  %v1263_v4 = vadd.f32 %v1068_v20, %v1178_v6 }
 0x107   : > { %v949_v45 = vpop.eup %948  ;;  %v647_v46 = vadd.f32 0.5, %v615_v38  ;;  %v613_v49 = vmul.f32 0.5, %v947_v42  ;;  %693 = vst.msk [vmem:[%s1149_s30 + $0x20] sm:$0xff] %vm688_vm2, %v660_v47  ;;  %v663_v50 = vmul.f32 %v631_v43, %v1117_v57  ;;  %v1230_v57 = vadd.f32 %v1068_v20, %v1154_v32 }
 0x108   : > { %v629_v23 = vadd.f32 0.5, %v597_v44  ;;  %v602_v53 = vmul.f32 0.5, %v949_v45  ;;  %709 = vst.msk [vmem:[%s1149_s30 + $0xa0] sm:$0xff] %vm688_vm2, %v676_v48  ;;  %v951_v55 = vpop.eup %950  ;;  %v555_v58 = vmul.f32 0.5, %v1219_v51  ;;  %v1267_v33 = vadd.f32 %v1186_v11, %v1068_v20 }
 0x109   : > { %v679_v54 = vmul.f32 %v647_v46, %v1122_v62  ;;  %v645_v52 = vadd.f32 0.5, %v613_v49  ;;  %696 = vst.msk [vmem:[%s1149_s30 + $0x38] sm:$0xff] %vm688_vm2, %v663_v50  ;;  %v1238_v62 = vadd.f32 %v1169_v61, %v1068_v20  ;;  %v953_v27 = vpop.eup %952  ;;  %v618_v32 = vmul.f32 0.5, %v951_v55 }
 0x10a   : > { %v661_v22 = vmul.f32 %v629_v23, %v1126_v0  ;;  %v634_v56 = vadd.f32 0.5, %v602_v53  ;;  %v553_v60 = vmul.f32 0.5, %v1230_v57  ;;  %v600_v2 = vmul.f32 0.5, %v953_v27 }
 0x10b   : > { %712 = vst.msk [vmem:[%s1149_s30 + $0xb8] sm:$0xff] %vm688_vm2, %v679_v54  ;;  %v677_v31 = vmul.f32 %v645_v52, %v1129_v1  ;;  %958 = vtanh.f32 %v555_v58  ;;  %v542_v61 = vmul.f32 0.5, %v1238_v62  ;;  %v650_v28 = vadd.f32 0.5, %v618_v32 }
 0x10c   : > { %694 = vst.msk [vmem:[%s1149_s30 + $0x28] sm:$0xff] %vm688_vm2, %v661_v22  ;;  %v666_v0 = vmul.f32 %v634_v56, %v1136_v12  ;;  %960 = vtanh.f32 %v537_v59  ;;  %v1253_v1 = vadd.f32 %v1171_v63, %v1068_v20  ;;  %v632_v12 = vadd.f32 0.5, %v600_v2 }
 0x10d   : > { %710 = vst.msk [vmem:[%s1149_s30 + $0xa8] sm:$0xff] %vm688_vm2, %v677_v31  ;;  %962 = vtanh.f32 %v553_v60  ;;  %v682_v63 = vmul.f32 %v650_v28, %v1139_v13  ;;  %v540_v7 = vmul.f32 0.5, %v1257_v3  ;;  %v556_v14 = vmul.f32 0.5, %v1263_v4 }
 0x10e   : > { %699 = vst.msk [vmem:[%s1149_s30 + $0x50] sm:$0xff] %vm688_vm2, %v666_v0  ;;  %964 = vtanh.f32 %v542_v61  ;;  %v558_v5 = vmul.f32 0.5, %v1253_v1  ;;  %v955_v8 = vpop.eup %954  ;;  %v664_v9 = vmul.f32 %v632_v12, %v1142_v19  ;;  %v543_v6 = vmul.f32 0.5, %v1267_v33 }
 0x10f   : > { %v1277_v16 = vadd.f32 %v1188_v34, %v1068_v20  ;;  %v957_v11 = vpop.eup %956  ;;  %715 = vst.msk [vmem:[%s1149_s30 + $0xd0] sm:$0xff] %vm688_vm2, %v682_v63  ;;  %v616_v13 = vmul.f32 0.5, %v955_v8  ;;  %v1283_v17 = vadd.f32 %v1068_v20, %v1196_v39  ;;  %v1287_v19 = vadd.f32 %v1068_v20, %v1198_v15 }
 0x110   : > { %966 = vtanh.f32 %v558_v5  ;;  %697 = vst.msk [vmem:[%s1149_s30 + $0x40] sm:$0xff] %vm688_vm2, %v664_v9  ;;  %v603_v18 = vmul.f32 0.5, %v957_v11 }
 0x111   : > { %968 = vtanh.f32 %v540_v7  ;;  %v559_v34 = vmul.f32 0.5, %v1277_v16  ;;  %v648_v26 = vadd.f32 0.5, %v616_v13  ;;  %v541_v29 = vmul.f32 0.5, %v1283_v17 }
 0x112   : > { %970 = vtanh.f32 %v556_v14  ;;  %v557_v30 = vmul.f32 0.5, %v1287_v19  ;;  %v635_v39 = vadd.f32 0.5, %v603_v18 }
 0x113   : > { %972 = vtanh.f32 %v543_v6  ;;  %v680_v35 = vmul.f32 %v648_v26, %v1184_v10 }
 0x114   : > { %974 = vtanh.f32 %v559_v34  ;;  %v667_v15 = vmul.f32 %v635_v39, %v1194_v25 }
 0x115   : > { %v959_v20 = vpop.eup %958  ;;  %976 = vtanh.f32 %v541_v29  ;;  %713 = vst.msk [vmem:[%s1149_s30 + $0xc0] sm:$0xff] %vm688_vm2, %v680_v35 }
 0x116   : > { %v961_v40 = vpop.eup %960  ;;  %v619_v36 = vmul.f32 0.5, %v959_v20  ;;  %978 = vtanh.f32 %v557_v30  ;;  %700 = vst.msk [vmem:[%s1149_s30 + $0x58] sm:$0xff] %vm688_vm2, %v667_v15 }
 0x117   : > { %v963_v21 = vpop.eup %962  ;;  %v601_v37 = vmul.f32 0.5, %v961_v40 }
 0x118   : > { %v965_v38 = vpop.eup %964  ;;  %v651_v41 = vadd.f32 0.5, %v619_v36  ;;  %v617_v42 = vmul.f32 0.5, %v963_v21 }
 0x119   : > { %v633_v10 = vadd.f32 0.5, %v601_v37  ;;  %v606_v47 = vmul.f32 0.5, %v965_v38 }
 0x11a   : > { %v967_v43 = vpop.eup %966  ;;  %v683_v25 = vmul.f32 %v651_v41, %v1219_v51  ;;  %v649_v44 = vadd.f32 0.5, %v617_v42 }
 0x11b   : > { %v969_v45 = vpop.eup %968  ;;  %v665_v48 = vmul.f32 %v633_v10, %v1226_v24  ;;  %v638_v46 = vadd.f32 0.5, %v606_v47  ;;  %v622_v49 = vmul.f32 0.5, %v967_v43 }
 0x11c   : > { %v971_v50 = vpop.eup %970  ;;  %716 = vst.msk [vmem:[%s1149_s30 + $0xd8] sm:$0xff] %vm688_vm2, %v683_v25  ;;  %v681_v23 = vmul.f32 %v649_v44, %v1230_v57  ;;  %v604_v53 = vmul.f32 0.5, %v969_v45 }
 0x11d   : > { %v973_v54 = vpop.eup %972  ;;  %698 = vst.msk [vmem:[%s1149_s30 + $0x48] sm:$0xff] %vm688_vm2, %v665_v48  ;;  %v670_v52 = vmul.f32 %v638_v46, %v1238_v62  ;;  %v654_v51 = vadd.f32 0.5, %v622_v49  ;;  %v620_v55 = vmul.f32 0.5, %v971_v50 }
 0x11e   : > { %v975_v22 = vpop.eup %974  ;;  %714 = vst.msk [vmem:[%s1149_s30 + $0xc8] sm:$0xff] %vm688_vm2, %v681_v23  ;;  %v636_v24 = vadd.f32 0.5, %v604_v53  ;;  %v607_v56 = vmul.f32 0.5, %v973_v54 }
 0x11f   : > { %v977_v58 = vpop.eup %976  ;;  %703 = vst.msk [vmem:[%s1149_s30 + $0x70] sm:$0xff] %vm688_vm2, %v670_v52  ;;  %v686_v57 = vmul.f32 %v654_v51, %v1253_v1  ;;  %v652_v27 = vadd.f32 0.5, %v620_v55  ;;  %v623_v31 = vmul.f32 0.5, %v975_v22 }
 0x120   : > { %v979_v32 = vpop.eup %978  ;;  %v668_v62 = vmul.f32 %v636_v24, %v1257_v3  ;;  %v639_v59 = vadd.f32 0.5, %v607_v56  ;;  %v605_v60 = vmul.f32 0.5, %v977_v58 }
 0x121   : > { %719 = vst.msk [vmem:[%s1149_s30 + $0xf0] sm:$0xff] %vm688_vm2, %v686_v57  ;;  %v684_v0 = vmul.f32 %v652_v27, %v1263_v4  ;;  %v655_v2 = vadd.f32 0.5, %v623_v31  ;;  %v621_v61 = vmul.f32 0.5, %v979_v32 }
 0x122   : > { %701 = vst.msk [vmem:[%s1149_s30 + $0x60] sm:$0xff] %vm688_vm2, %v668_v62  ;;  %v671_v28 = vmul.f32 %v639_v59, %v1267_v33  ;;  %v637_v1 = vadd.f32 0.5, %v605_v60 }
 0x123   : > { %717 = vst.msk [vmem:[%s1149_s30 + $0xe0] sm:$0xff] %vm688_vm2, %v684_v0  ;;  %v687_v12 = vmul.f32 %v655_v2, %v1277_v16  ;;  %v653_v3 = vadd.f32 0.5, %v621_v61 }
 0x124   : > { %704 = vst.msk [vmem:[%s1149_s30 + $0x78] sm:$0xff] %vm688_vm2, %v671_v28  ;;  %v669_v63 = vmul.f32 %v637_v1, %v1283_v17 }
 0x125   : > { %720 = vst.msk [vmem:[%s1149_s30 + $0xf8] sm:$0xff] %vm688_vm2, %v687_v12  ;;  %v685_v4 = vmul.f32 %v653_v3, %v1287_v19 }
 0x126   : > { %702 = vst.msk [vmem:[%s1149_s30 + $0x68] sm:$0xff] %vm688_vm2, %v669_v63 }
 0x127   : > { %718 = vst.msk [vmem:[%s1149_s30 + $0xe8] sm:$0xff] %vm688_vm2, %v685_v4 }
 0x128 PF: > { %s13_s12 = sadd.s32 1, %s986_s12  }
 0x129   : > { %p10_p4 = scmp.ge.s32.totalorder %s13_s12, 4  }
 0x12b   :  { %12 = sbr.rel (!%p10_p4) target bundleno = 1 (0x1), region = 62 }

</bundles_post_ra>
